<compile_context>
chip_gen: v7x
topology: tpu7x:2x2x1
jax: 0.10.0
libtpu: 0.0.40
codegen_flags: <defaults>
</compile_context>

<pallas_src>
import jax
import jax.numpy as jnp
from jax.experimental import pallas as pl
from jax.experimental.pallas import tpu as pltpu


# ---------------------------------------------------------------------------
# Kernel bodies
# ---------------------------------------------------------------------------
def _pool_compute(x_ref, attn_ref, wrow_ref, pooled_ref, w_ref, mask=None):
    """
    x_ref     : (bb, T, H1) VMEM, streamed in its HBM dtype (f32 / bf16)
    attn_ref  : (bb, T, H2) VMEM, streamed in its HBM dtype
    wrow_ref  : (1, 1, H2)  VMEM, same dtype as attn (resident Linear weight row)
    pooled_ref: (bb, 1, H1) VMEM, f32
    w_ref     : (bb, 1, T)  VMEM, f32 (softmax weights, lane-dense over T)
    mask      : None or (bb, 1, T) int32 already loaded (0 => -inf pre-softmax)
    """
    bb = attn_ref.shape[0]
    h2 = attn_ref.shape[2]

    attn = attn_ref[...]                                    # native dtype, no f32 copy
    # Tiny per-step broadcast of the resident weight row (bb*H2 elems, native
    # dtype) so the scores contraction is the standard batched
    # contract-trailing-dims MXU pattern (no transpose of the big attn tile).
    wrow_b = jnp.broadcast_to(wrow_ref[...], (bb, 1, h2))

    # scores[b, 0, t] = sum_h w[h] * attn[b, t, h]   (MXU, f32 accumulation).
    # Linear bias omitted: softmax(s + c) == softmax(s) exactly.
    scores = jnp.einsum("bqh,bth->bqt", wrow_b, attn,
                        preferred_element_type=jnp.float32)      # (bb, 1, T) f32

    if mask is not None:
        # PyTorch: w[mask == 0] = -inf (fully-masked rows give NaN, as in torch).
        scores = jnp.where(mask == 0, -jnp.inf, scores)

    # Numerically stable softmax over T (lane axis); divide via EUP reciprocal.
    m = jnp.max(scores, axis=-1, keepdims=True)                  # (bb, 1, 1)
    p = jnp.exp(scores - m)                                      # (bb, 1, T)
    denom = jnp.sum(p, axis=-1, keepdims=True)                   # (bb, 1, 1)
    w = p * pl.reciprocal(denom, approx=True)                    # (bb, 1, T)
    w_ref[...] = w

    # pooled[b, 0, h] = sum_t w[b, 0, t] * x[b, t, h]  (MXU, f32 accumulation).
    # x stays in its native dtype; w is cast down to it for the MXU operands
    # (exact for f32 inputs, ~bf16 rounding of the probabilities for bf16 x).
    x = x_ref[...]
    pooled = jnp.einsum("bqt,bth->bqh", w.astype(x.dtype), x,
                        preferred_element_type=jnp.float32)      # (bb, 1, H1) f32
    pooled_ref[...] = pooled


def _attn_pool_kernel(x_ref, attn_ref, wrow_ref, pooled_ref, w_ref):
    _pool_compute(x_ref, attn_ref, wrow_ref, pooled_ref, w_ref, mask=None)


def _attn_pool_kernel_masked(x_ref, attn_ref, wrow_ref, mask_ref, pooled_ref, w_ref):
    _pool_compute(x_ref, attn_ref, wrow_ref, pooled_ref, w_ref, mask=mask_ref[...])


# ---------------------------------------------------------------------------
# Sizing helpers
# ---------------------------------------------------------------------------
def _vmem_plan():
    """(stream_budget_bytes, vmem_limit_bytes, target_step_hbm_bytes) per chip."""
    cap = 64 * 1024 * 1024                     # conservative default (v7x-sized)
    try:
        info = pltpu.get_tpu_info()
        cap = int(getattr(info, "vmem_capacity_bytes", cap)) or cap
    except Exception:
        pass
    cap = max(cap, 32 * 1024 * 1024)
    stream_budget = cap // 4                                   # double-buffered streams
    vmem_limit = max(32 << 20, min((cap * 3) // 4, 100 << 20))  # 48 MiB v7x / 96 MiB v5e,v6e
    # Per-step HBM byte target: bigger on v7x (3.2 TB/s HBM makes per-step
    # pipeline overhead proportionally more expensive).
    target_step = (8 << 20) if cap <= (64 << 20) else (4 << 20)
    return stream_budget, vmem_limit, target_step


def _plan_grid(B, T, H1, H2, x_bytes, a_bytes, has_mask,
               stream_budget, target_step, block_b=None):
    """Pick the batch block bb and the 1-D grid length (ragged last block ok)."""
    def pad(a, m):
        return -(-a // m) * m

    def sub(nbytes):                      # dtype-dependent sublane tile
        return max(8, 32 // max(1, nbytes))

    # Double-buffered pipeline blocks, per batch row (with (sublane,128) padding).
    stream_b = (pad(T, sub(x_bytes)) * pad(H1, 128) * x_bytes       # x block
                + pad(T, sub(a_bytes)) * pad(H2, 128) * a_bytes     # attn block
                + 8 * pad(T, 128) * 4                                # w out block
                + 8 * pad(H1, 128) * 4)                              # pooled out block
    if has_mask:
        stream_b += 8 * pad(T, 128) * 4                              # int32 mask block
    # Single-buffered in-kernel f32 temporaries (scores / exp / w + pooled acc).
    temp_b = 3 * 8 * pad(T, 128) * 4 + 8 * pad(H1, 128) * 4
    vmem_b = 2 * stream_b + temp_b

    # HBM bytes moved per batch row per step.
    hbm_b = T * (H1 * x_bytes + H2 * a_bytes) + (T + H1) * 4
    if has_mask:
        hbm_b += T * 4

    if block_b is not None:
        bb = max(1, min(int(block_b), B))
    else:
        bb_vmem = max(1, stream_budget // max(vmem_b, 1))
        bb_target = max(1, -(-target_step // hbm_b))
        bb = max(1, min(bb_vmem, bb_target, B))
        # Keep >= 4 grid steps (v7x: 2 TCs x per-core double buffering) whenever
        # each step still moves >= 2 MiB of HBM.
        if B >= 4:
            bb_q = max(1, B // 4)
            if bb > bb_q and bb_q * hbm_b >= (2 << 20):
                bb = bb_q

    # Prefer an exact divisor of B when one is within 2x of the cap, otherwise
    # run with a ragged last block (Pallas masks the out-of-range tail).
    for d in range(bb, 0, -1):
        if B % d == 0:
            if 2 * d >= bb:
                return d, B // d
            break
    return bb, -(-B // bb)


# ---------------------------------------------------------------------------
# Wrapper
# ---------------------------------------------------------------------------
def attention_pooling2(x, attn, weight, bias=None, mask=None, block_b=None):
    """
    x      : (B, T, H1)  float dtype (streamed as-is, no up-cast)
    attn   : (B, T, H2)  float dtype (streamed as-is)
    weight : (1, H2)     torch nn.Linear(H2, 1).weight layout
    bias   : (1,)        torch nn.Linear(H2, 1).bias (accepted for API parity;
                         it cancels exactly in the softmax so it is not used)
    mask   : None, (B,), or (B, T); entries == 0 are masked to -inf pre-softmax
    Returns (pooled (B, H1) float32, w (B, T, 1) float32)
    """
    del bias  # softmax(s + c) == softmax(s); only post-softmax w is returned.

    x = jnp.asarray(x)
    attn = jnp.asarray(attn)
    B, T, H1 = x.shape
    _, _, H2 = attn.shape
    in_dtype = attn.dtype

    # Resident lane-dense weight row, pre-cast to the streamed dtype so the MXU
    # consumes native bf16/f32 operands with f32 accumulation.
    wrow = jnp.asarray(weight).reshape(1, 1, H2).astype(in_dtype)

    has_mask = mask is not None
    stream_budget, vmem_limit, target_step = _vmem_plan()
    bb, grid_n = _plan_grid(B, T, H1, H2, x.dtype.itemsize, attn.dtype.itemsize,
                            has_mask, stream_budget, target_step, block_b)

    flops = 2 * B * T * (H1 + H2)
    bytes_accessed = (x.size * x.dtype.itemsize
                      + attn.size * attn.dtype.itemsize
                      + H2 * in_dtype.itemsize
                      + B * H1 * 4 + B * T * 4
                      + (B * T * 4 if has_mask else 0))
    cost = pl.CostEstimate(flops=flops, transcendentals=B * (T + 1),
                           bytes_accessed=bytes_accessed)

    cparams = pltpu.CompilerParams(
        dimension_semantics=("parallel",),     # batch-block axis; shardable on v7x
        vmem_limit_bytes=int(vmem_limit),
    )

    out_shape = (
        jax.ShapeDtypeStruct((B, 1, H1), jnp.float32),   # pooled, lane-dense H1
        jax.ShapeDtypeStruct((B, 1, T), jnp.float32),    # softmax w, lane-dense T
    )
    out_specs = [
        pl.BlockSpec((bb, 1, H1), lambda b: (b, 0, 0)),
        pl.BlockSpec((bb, 1, T), lambda b: (b, 0, 0)),
    ]
    in_specs = [
        pl.BlockSpec((bb, T, H1), lambda b: (b, 0, 0)),          # x (native dtype)
        pl.BlockSpec((bb, T, H2), lambda b: (b, 0, 0)),          # attn (native dtype)
        pl.BlockSpec((1, 1, H2), lambda b: (0, 0, 0)),           # weight row (resident)
    ]
    args = [x, attn, wrow]
    kernel = _attn_pool_kernel

    if has_mask:
        m = jnp.asarray(mask)
        if m.ndim == 1:                      # (B,) per-batch mask, per the docstring
            m = jnp.broadcast_to(m[:, None], (B, T))
        m3 = (m != 0).astype(jnp.int32).reshape(B, 1, T)          # lane-dense mask
        in_specs.append(pl.BlockSpec((bb, 1, T), lambda b: (b, 0, 0)))
        args.append(m3)
        kernel = _attn_pool_kernel_masked

    pooled3, w3 = pl.pallas_call(
        kernel,
        out_shape=out_shape,
        grid_spec=pltpu.PrefetchScalarGridSpec(
            num_scalar_prefetch=0, grid=(grid_n,),
            in_specs=in_specs, out_specs=out_specs),
        compiler_params=cparams,
        cost_estimate=cost,
    )(*args)

    # (B,1,H1)->(B,H1) and (B,1,T)->(B,T,1): row-major order preserved => free.
    return pooled3.reshape(B, H1), w3.reshape(B, T, 1)


# ---------------------------------------------------------------------------
# Pure-JAX reference (mirrors the PyTorch forward, including the bias add)
# ---------------------------------------------------------------------------
def _reference(x, attn, weight, bias, mask=None):
    w32 = jnp.asarray(weight, jnp.float32)
    b32 = jnp.asarray(bias, jnp.float32)
    scores = jnp.einsum("bth,oh->bto", attn.astype(jnp.float32), w32) + b32
    if mask is not None:
        m = jnp.asarray(mask)
        if m.ndim == 1:
            m = jnp.broadcast_to(m[:, None], scores.shape[:2])
        scores = jnp.where((m == 0).reshape(scores.shape[0], scores.shape[1], 1),
                           -jnp.inf, scores)
    w = jax.nn.softmax(scores, axis=1)
    pooled = jnp.sum(w * x.astype(jnp.float32), axis=1)
    return pooled, w


if __name__ == "__main__":
    B, T, H1, H2 = 2, 8, 32, 32   # in_dim == H2

    key = jax.random.PRNGKey(0)
    kx, ka, kw, kb, km = jax.random.split(key, 5)
    x = jax.random.normal(kx, (B, T, H1), jnp.float32)
    attn = jax.random.normal(ka, (B, T, H2), jnp.float32)
    weight = jax.random.normal(kw, (1, H2), jnp.float32) * 0.1   # nn.Linear(H2, 1).weight
    bias = jax.random.normal(kb, (1,), jnp.float32) * 0.1        # nn.Linear(H2, 1).bias

    # Tolerance: pl.reciprocal(approx=True) bounds relative error at ~1e-3-1e-4,
    # everything else is exact f32 for these inputs.
    ATOL = RTOL = 2e-3

    # ---- mask=None path (no mask stream, no where) ----
    pooled, w = attention_pooling2(x, attn, weight, bias, mask=None)
    pooled = jax.block_until_ready(pooled)
    w = jax.block_until_ready(w)
    pooled_ref, w_ref = _reference(x, attn, weight, bias, mask=None)
    assert pooled.shape == (B, H1) and w.shape == (B, T, 1)
    assert jnp.allclose(pooled, pooled_ref, atol=ATOL, rtol=RTOL)
    assert jnp.allclose(w, w_ref, atol=ATOL, rtol=RTOL)

    # ---- masked path (lane-dense (B,1,T) int32 mask stream) ----
    mask = (jax.random.uniform(km, (B, T)) > 0.3).astype(jnp.float32)
    mask = mask.at[:, 0].set(1.0)   # keep >=1 live position per row (avoid NaN rows)
    pooled_m, w_m = attention_pooling2(x, attn, weight, bias, mask=mask)
    pooled_m = jax.block_until_ready(pooled_m)
    w_m = jax.block_until_ready(w_m)
    pooled_mr, w_mr = _reference(x, attn, weight, bias, mask=mask)
    assert jnp.allclose(pooled_m, pooled_mr, atol=ATOL, rtol=RTOL)
    assert jnp.allclose(w_m, w_mr, atol=ATOL, rtol=RTOL)

    print("KERNEL_OK")
</pallas_src>

<mosaic_0001>
module attributes {stable_mosaic.version = 11 : i64} {
  func.func @_attn_pool_kernel(%arg0: i32, %arg1: memref<2x8x32xf32, #tpu.memory_space<vmem>>, %arg2: memref<2x8x32xf32, #tpu.memory_space<vmem>>, %arg3: memref<1x1x32xf32, #tpu.memory_space<vmem>>, %arg4: memref<2x1x32xf32, #tpu.memory_space<vmem>>, %arg5: memref<2x1x8xf32, #tpu.memory_space<vmem>>) attributes {dimension_semantics = [#tpu.dimension_semantics<parallel>], iteration_bounds = array<i64: 1>, scalar_prefetch = 0 : i64, scratch_operands = 0 : i64, tpu.core_type = #tpu.core_type<tc>, window_params = [{transform_indices = @transform_0, window_bounds = array<i64: 2, 8, 32>}, {transform_indices = @transform_1, window_bounds = array<i64: 2, 8, 32>}, {pipeline_mode = #tpu.pipeline_mode<synchronous>, transform_indices = @transform_2, window_bounds = array<i64: 1, 1, 32>}, {transform_indices = @transform_3, window_bounds = array<i64: 2, 1, 32>}, {transform_indices = @transform_4, window_bounds = array<i64: 2, 1, 8>}]} {
    %c0 = arith.constant 0 : index
    %c0_0 = arith.constant 0 : index
    %c0_1 = arith.constant 0 : index
    %0 = vector.load %arg2[%c0, %c0_0, %c0_1] : memref<2x8x32xf32, #tpu.memory_space<vmem>>, vector<2x8x32xf32>
    %c0_2 = arith.constant 0 : index
    %c0_3 = arith.constant 0 : index
    %c0_4 = arith.constant 0 : index
    %1 = vector.load %arg3[%c0_2, %c0_3, %c0_4] : memref<1x1x32xf32, #tpu.memory_space<vmem>>, vector<1x1x32xf32>
    %2 = vector.shape_cast %1 : vector<1x1x32xf32> to vector<1x1x32xf32>
    %3 = vector.broadcast %2 : vector<1x1x32xf32> to vector<2x1x32xf32>
    "tpu.trace_start"() <{level = 10 : i32, message = "bqh,bth->bqt"}> : () -> ()
    %cst = arith.constant dense<0.000000e+00> : vector<2x1x8xf32>
    %4 = tpu.matmul %3, %0, %cst {dimension_numbers = #tpu.dot_dimension_numbers<[2], [2], [1], [1], [0, 0, 0, 1, 1, 1], [0], [0]>} : vector<2x1x32xf32>, vector<2x8x32xf32>, vector<2x1x8xf32> -> vector<2x1x8xf32>
    "tpu.trace_stop"() : () -> ()
    %cst_5 = arith.constant dense<0xFF800000> : vector<2x1xf32>
    %5 = vector.multi_reduction <maximumf>, %4, %cst_5 [2] : vector<2x1x8xf32> to vector<2x1xf32>
    %6 = vector.shape_cast %5 : vector<2x1xf32> to vector<2x1x1xf32>
    %7 = vector.broadcast %6 : vector<2x1x1xf32> to vector<2x1x8xf32>
    %8 = arith.subf %4, %7 : vector<2x1x8xf32>
    %9 = math.exp %8 : vector<2x1x8xf32>
    %cst_6 = arith.constant dense<0.000000e+00> : vector<2x1xf32>
    %10 = vector.multi_reduction <add>, %9, %cst_6 [2] : vector<2x1x8xf32> to vector<2x1xf32>
    %11 = vector.shape_cast %10 : vector<2x1xf32> to vector<2x1x1xf32>
    %12 = tpu.reciprocal %11 {approx = true} : vector<2x1x1xf32> -> vector<2x1x1xf32>
    %13 = vector.broadcast %12 : vector<2x1x1xf32> to vector<2x1x8xf32>
    %14 = arith.mulf %9, %13 : vector<2x1x8xf32>
    %c0_7 = arith.constant 0 : index
    %c0_8 = arith.constant 0 : index
    %c0_9 = arith.constant 0 : index
    %15 = vector.load %arg5[%c0_7, %c0_8, %c0_9] : memref<2x1x8xf32, #tpu.memory_space<vmem>>, vector<2x1x8xf32>
    tpu.vector_store %arg5[%c0_7, %c0_8, %c0_9], %14 {strides = array<i32>} : memref<2x1x8xf32, #tpu.memory_space<vmem>>, vector<2x1x8xf32>,
    %c0_10 = arith.constant 0 : index
    %c0_11 = arith.constant 0 : index
    %c0_12 = arith.constant 0 : index
    %16 = vector.load %arg1[%c0_10, %c0_11, %c0_12] : memref<2x8x32xf32, #tpu.memory_space<vmem>>, vector<2x8x32xf32>
    "tpu.trace_start"() <{level = 10 : i32, message = "bqt,bth->bqh"}> : () -> ()
    %cst_13 = arith.constant dense<0.000000e+00> : vector<2x1x32xf32>
    %17 = tpu.matmul %14, %16, %cst_13 {dimension_numbers = #tpu.dot_dimension_numbers<[2], [1], [1], [2], [0, 0, 0, 1, 1, 2], [0], [0]>} : vector<2x1x8xf32>, vector<2x8x32xf32>, vector<2x1x32xf32> -> vector<2x1x32xf32>
    "tpu.trace_stop"() : () -> ()
    %c0_14 = arith.constant 0 : index
    %c0_15 = arith.constant 0 : index
    %c0_16 = arith.constant 0 : index
    %18 = vector.load %arg4[%c0_14, %c0_15, %c0_16] : memref<2x1x32xf32, #tpu.memory_space<vmem>>, vector<2x1x32xf32>
    tpu.vector_store %arg4[%c0_14, %c0_15, %c0_16], %17 {strides = array<i32>} : memref<2x1x32xf32, #tpu.memory_space<vmem>>, vector<2x1x32xf32>,
    return
  }
  func.func @transform_0(%arg0: i32) -> (i32, i32, i32) {
    %c0_i32 = arith.constant 0 : i32
    %c0_i32_0 = arith.constant 0 : i32
    %c0_i32_1 = arith.constant 0 : i32
    return %arg0, %c0_i32, %c0_i32_0 : i32, i32, i32
  }
  func.func @transform_1(%arg0: i32) -> (i32, i32, i32) {
    %c0_i32 = arith.constant 0 : i32
    %c0_i32_0 = arith.constant 0 : i32
    %c0_i32_1 = arith.constant 0 : i32
    return %arg0, %c0_i32, %c0_i32_0 : i32, i32, i32
  }
  func.func @transform_2(%arg0: i32) -> (i32, i32, i32) {
    %c0_i32 = arith.constant 0 : i32
    %c0_i32_0 = arith.constant 0 : i32
    %c0_i32_1 = arith.constant 0 : i32
    %c0_i32_2 = arith.constant 0 : i32
    return %c0_i32, %c0_i32_0, %c0_i32_1 : i32, i32, i32
  }
  func.func @transform_3(%arg0: i32) -> (i32, i32, i32) {
    %c0_i32 = arith.constant 0 : i32
    %c0_i32_0 = arith.constant 0 : i32
    %c0_i32_1 = arith.constant 0 : i32
    return %arg0, %c0_i32, %c0_i32_0 : i32, i32, i32
  }
  func.func @transform_4(%arg0: i32) -> (i32, i32, i32) {
    %c0_i32 = arith.constant 0 : i32
    %c0_i32_0 = arith.constant 0 : i32
    %c0_i32_1 = arith.constant 0 : i32
    return %arg0, %c0_i32, %c0_i32_0 : i32, i32, i32
  }
}

</mosaic_0001>

<bundles_post_ra>
// kernel: tpu_custom_call.1
= control target key start
LH: loop header
LB: loop body
LE: loop exit
PB: predicated region body
PF: predicated region fallthrough
CT: control target
= control target key end

     0   :  { %10 = vsyncpa [#allocation3], 0  ;;  %s650_s0 = inlined_call_operand.hbm [shape: f32[2,8,32], index: 0, kind: input, shape index: {}]   ;;  %s651_s1 = inlined_call_operand.hbm [shape: f32[2,8,32], index: 1, kind: input, shape index: {}]   ;;  %s652_s2 = inlined_call_operand.vmem [shape: f32[1,1,32], index: 2, kind: input, shape index: {}]   ;;  %s653_s3 = inlined_call_operand.hbm [shape: f32[2,1,32], index: 3, kind: output, shape index: {0}]   ;;  %s654_s4 = inlined_call_operand.hbm [shape: f32[2,1,8], index: 4, kind: output, shape index: {1}]  }
   0x1   :  { %11 = vsyncpa [#allocation6], 0 }
   0x2   :  { %12 = vsyncpa [#allocation4], 0 }
   0x3   :  { %13 = vsyncpa [#allocation9], 0  ;;  %s558_s15 = smov [#allocation2]   ;;  %s462_s19 = scalar_lea.hbm %s650_s0, 256 }
   0x4   :  { %s19_s16 = sshll.u32 %s558_s15, 4  ;;  %p463_p0 = scmp.ne.s32.totalorder %s650_s0, %s462_s19  ;;  %s20_s16 = int_to_ptr.vmem [resolvable:$true] %s19_s16 }
   0x5   :  { %p466_p1 = scmp.lt.u32.totalorder %s462_s19, %s650_s0 }
   0x7   :  { %p468_p2 = pnand %p466_p1, %p463_p0 }
   0x9   :  { %471 = shalt.err (!%p468_p2)
}
   0xa   :  { %s472_s24 = scalar_lea.vmem %s20_s16, 256  ;;  %p477_p4 = scmp.lt.s32.totalorder %s20_s16, %s20_s16 }
   0xb   :  { %p473_p3 = scmp.ne.s32.totalorder %s20_s16, %s472_s24  ;;  %p478_p5 = scmp.lt.s32.totalorder %s472_s24, %s472_s24 }
   0xd   :  { %p479_p6 = por %p478_p5, %p477_p4 }
   0xf   :  { %p480_p7 = pnand %p479_p6, %p473_p3 }
  0x11   :  { %483 = shalt.err (!%p480_p7)
}
  0x12   :  { %s559_s25 = smov 128   ;;  %s560_s26 = smov 8  }
  0x13   :  { %25 = dma.hbm_to_vmem [thread:$0]  %s650_s0, 256, %s20_s16, [#allocation3], %s559_s25, %s559_s25, %s560_s26  }
  0x14   :  { %s561_s29 = smov [#allocation5]   ;;  %s484_s7 = scalar_lea.hbm %s651_s1, 256 }
  0x15   :  { %s31_s30 = sshll.u32 %s561_s29, 4  ;;  %p485_p8 = scmp.ne.s32.totalorder %s651_s1, %s484_s7  ;;  %s32_s30 = int_to_ptr.vmem [resolvable:$true] %s31_s30 }
  0x16   :  { %p488_p9 = scmp.lt.u32.totalorder %s484_s7, %s651_s1 }
  0x18   :  { %p490_p10 = pnand %p488_p9, %p485_p8 }
  0x1a   :  { %493 = shalt.err (!%p490_p10)
}
  0x1b   :  { %s494_s12 = scalar_lea.vmem %s32_s30, 256  ;;  %p499_p12 = scmp.lt.s32.totalorder %s32_s30, %s32_s30 }
  0x1c   :  { %p495_p11 = scmp.ne.s32.totalorder %s32_s30, %s494_s12  ;;  %p500_p13 = scmp.lt.s32.totalorder %s494_s12, %s494_s12 }
  0x1e   :  { %p501_p0 = por %p500_p13, %p499_p12 }
  0x20   :  { %p502_p1 = pnand %p501_p0, %p495_p11 }
  0x22   :  { %505 = shalt.err (!%p502_p1)
}
  0x23   :  { %37 = dma.hbm_to_vmem [thread:$0]  %s651_s1, 256, %s32_s30, [#allocation6], %s559_s25, %s559_s25, %s560_s26  }
  0x24   :  { %550 = dma.done.wait [#allocation3], 256  }
  0x25   :  { %551 = vsyncadd [#allocation3], 4294967040 }
  0x26   :  { %552 = dma.done.wait [#allocation6], 256  }
  0x27   :  { %553 = vsyncadd [#allocation6], 4294967040  ;;  %v562_v0 = vmov 0.0   ;;  %vm563_vm0 = vmmov 0   ;;  %vm49_vm1 = vcmask 261120   ;;  %v46_v1 = vld [vmem:[#allocation5] sm:$0xff] }
  0x28   :  { %424 = vmatprep.subr.mxu0 %v562_v0  ;;  %426 = vmatprep.mubr.msk.f32.mxu0 %vm563_vm0, %v562_v0  ;;  %v47_v2 = vld [vmem:[#allocation5 + $0x8] sm:$0xff]  ;;  %v48_v3 = vld [vmem:[%s652_s2] sm:$0x1]  ;;  %vm199_vm2 = vcmask 57344   ;;  %v225_v21 = vld [vmem:[#allocation2 + $0x8] sm:$0xff]  ;;  %vm226_vm3 = vcmask 64512  }
  0x29   :  { %429 = vmatprep.subr.mxu1 %v562_v0  ;;  %431 = vmatprep.mubr.msk.f32.mxu1 %vm563_vm0, %v562_v0  ;;  %v224_v20 = vld [vmem:[#allocation2] sm:$0xff]  ;;  %s564_s1 = smov [#allocation8]  }
  0x2a   :  { %425 = vmatpush3.xpose.msk.msra.mxu0 %vm49_vm1, %v46_v1  ;;  %430 = vmatpush3.xpose.msk.msra.mxu1 %vm49_vm1, %v47_v2  ;;  %s393_s2 = sshll.u32 %s564_s1, 4  ;;  %s394_s2 = int_to_ptr.vmem [resolvable:$true] %s393_s2 }
  0x2b   :  { %434 = vmatprep.subr.mxu0 %v562_v0  ;;  %439 = vmatprep.subr.mxu1 %v562_v0  ;;  %s506_s16 = scalar_lea.vmem %s394_s2, 32  ;;  %p511_p3 = scmp.lt.s32.totalorder %s394_s2, %s394_s2 }
  0x2c   :  { %p507_p2 = scmp.ne.s32.totalorder %s394_s2, %s506_s16  ;;  %p512_p4 = scmp.lt.s32.totalorder %s506_s16, %s506_s16 }
  0x2d   :  { %427 = vmatmul.mubr.msk.f32.vlgmr.msra.gmra.mrb[0].mxu0 %vm49_vm1, %v48_v3  ;;  %432 = vmatmul.mubr.msk.f32.vlgmr.msra.gmra.mrb[0].mxu1 %vm49_vm1, %v48_v3 }
  0x2e   :  { %436 = vmatprep.mubr.msk.f32.mxu0 %vm563_vm0, %v562_v0  ;;  %441 = vmatprep.mubr.msk.f32.mxu1 %vm563_vm0, %v562_v0  ;;  %p513_p5 = por %p512_p4, %p511_p3 }
  0x2f   :  { %435 = vmatpush3.msra.mxu0 %v224_v20  ;;  %440 = vmatpush3.msra.mxu1 %v225_v21 }
  0x30   :  { %p514_p6 = pnand %p513_p5, %p507_p2 }
 0x100   :  { %v122_v4 = vpop.f32.mrb[0].mxu0  ;;  %v195_v5 = vpop.f32.mrb[0].mxu1 }
 0x101   :  { %v428_v6 = vpop.f32.mrb[1].mxu0  ;;  %v200_v7 = vsel %vm199_vm2, %v122_v4, -inf  ;;  %v433_v8 = vpop.f32.mrb[1].mxu1  ;;  %v203_v9 = vsel %vm199_vm2, %v195_v5, -inf }
 0x102   :  { %201 = vmax.xlane.f32.xlu0 %v200_v7 }
 0x106   :  { %204 = vmax.xlane.f32.xlu0 %v203_v9 }
 0x18f   :  { %v202_v10 = vpop.xlane.xlu0 %201 }
 0x190   :  { %v206_v11 = vsub.f32 %v122_v4, %v202_v10 }
 0x192   :  { %v208_v12 = vmul.f32 1.442695, %v206_v11 }
 0x193   :  { %v205_v13 = vpop.xlane.xlu0 %204 }
 0x194   :  { %454 = vpow2.f32 %v208_v12  ;;  %v207_v14 = vsub.f32 %v195_v5, %v205_v13 }
 0x196   :  { %v210_v15 = vmul.f32 1.442695, %v207_v14 }
 0x198   :  { %456 = vpow2.f32 %v210_v15 }
 0x19e   :  { %v455_v16 = vpop.eup %454 }
 0x19f   :  { %v212_v17 = vsel %vm199_vm2, %v455_v16, 0.0 }
 0x1a0   :  { %213 = vadd.xlane.f32.xlu1 %v212_v17 }
 0x1a2   :  { %v457_v18 = vpop.eup %456 }
 0x1a3   :  { %v215_v19 = vsel %vm199_vm2, %v457_v18, 0.0 }
 0x1a4   :  { %216 = vadd.xlane.f32.xlu1 %v215_v19 }
 0x22d   :  { %v214_v22 = vpop.xlane.xlu1 %213 }
 0x22e   :  { %458 = vrcp.f32 %v214_v22 }
 0x231   :  { %v217_v23 = vpop.xlane.xlu1 %216 }
 0x232   :  { %460 = vrcp.f32 %v217_v23 }
 0x238   :  { %v459_v24 = vpop.eup %458 }
 0x239   :  { %v220_v25 = vmul.f32 %v459_v24, %v455_v16 }
 0x23b   :  { %222 = vst.msk [vmem:[#allocation8] sm:$0x1] %vm199_vm2, %v220_v25  ;;  %437 = vmatmul.mubr.msk.f32.vlgmr.msra.gmra.mrb[2].mxu0 %vm226_vm3, %v220_v25 }
 0x23c   :  { %v461_v26 = vpop.eup %460 }
 0x23d   :  { %v221_v27 = vmul.f32 %v461_v26, %v457_v18 }
 0x23f   :  { %223 = vst.msk [vmem:[#allocation8 + $0x1] sm:$0x1] %vm199_vm2, %v221_v27  ;;  %442 = vmatmul.mubr.msk.f32.vlgmr.msra.gmra.mrb[2].mxu1 %vm226_vm3, %v221_v27 }
 0x240   :  { %517 = shalt.err (!%p514_p6)
}
 0x241   :  { %s518_s19 = scalar_lea.hbm %s654_s4, 32 }
 0x242   :  { %p519_p7 = scmp.ne.s32.totalorder %s654_s4, %s518_s19  ;;  %p522_p8 = scmp.lt.u32.totalorder %s518_s19, %s654_s4 }
 0x244   :  { %p524_p9 = pnand %p522_p8, %p519_p7 }
 0x246   :  { %527 = shalt.err (!%p524_p9)
}
 0x247   :  { %s565_s24 = smov 16   ;;  %s566_s25 = smov 1   ;;  %vm373_vm4 = vcmask 253952  }
 0x248   :  { %399 = dma.vmem_to_hbm [thread:$0]  %s394_s2, 32, %s654_s4, [#allocation9], %s565_s24, %s565_s24, %s566_s25  }
 0x249   :  { %s567_s28 = smov [#allocation7]  }
 0x24a   :  { %s381_s29 = sshll.u32 %s567_s28, 4  ;;  %s382_s29 = int_to_ptr.vmem [resolvable:$true] %s381_s29 }
 0x24b   :  { %s528_s30 = scalar_lea.vmem %s382_s29, 32  ;;  %p533_p11 = scmp.lt.s32.totalorder %s382_s29, %s382_s29 }
 0x24c   :  { %p529_p10 = scmp.ne.s32.totalorder %s382_s29, %s528_s30  ;;  %p534_p12 = scmp.lt.s32.totalorder %s528_s30, %s528_s30 }
 0x24e   :  { %p535_p13 = por %p534_p12, %p533_p11 }
 0x250   :  { %p536_p0 = pnand %p535_p13, %p529_p10 }
 0x30e   :  { %v296_v28 = vpop.f32.mrb[2].mxu0 }
 0x30f   :  { %374 = vst.msk [vmem:[#allocation7] sm:$0x1] %vm373_vm4, %v296_v28  ;;  %v438_v29 = vpop.f32.mrb[3].mxu0 }
 0x312   :  { %v369_v30 = vpop.f32.mrb[2].mxu1 }
 0x313   :  { %375 = vst.msk [vmem:[#allocation7 + $0x1] sm:$0x1] %vm373_vm4, %v369_v30  ;;  %v443_v31 = vpop.f32.mrb[3].mxu1 }
 0x314   :  { %539 = shalt.err (!%p536_p0)
}
 0x315   :  { %s540_s4 = scalar_lea.hbm %s653_s3, 32 }
 0x316   :  { %p541_p1 = scmp.ne.s32.totalorder %s653_s3, %s540_s4  ;;  %p544_p2 = scmp.lt.u32.totalorder %s540_s4, %s653_s3 }
 0x318   :  { %p546_p3 = pnand %p544_p2, %p541_p1 }
 0x31a   :  { %549 = shalt.err (!%p546_p3)
}
 0x31b   :  { %387 = dma.vmem_to_hbm [thread:$0]  %s382_s29, 32, %s653_s3, [#allocation4], %s565_s24, %s565_s24, %s566_s25  }
 0x31c   :  { %554 = dma.done.wait [#allocation4], 32  }
 0x31d   :  { %555 = vsyncadd [#allocation4], 4294967264 }
 0x31e   :  { %556 = dma.done.wait [#allocation9], 32  }
 0x31f   :  { %557 = vsyncadd [#allocation9], 4294967264 }
 0x320   :  { %406 = vsyncpa [#allocation3], 1 }
 0x321   :  { %407 = vsyncpa [#allocation6], 1 }
 0x322   :  { %408 = vsyncpa [#allocation4], 1 }
 0x323   :  { %409 = vsyncpa [#allocation9], 1 }

</bundles_post_ra>
